<compile_context>
chip_gen: v5e
topology: v5e:2x2
jax: 0.10.0
libtpu: 0.0.40
codegen_flags: <defaults>
</compile_context>

<pallas_src>
import math

import jax
import jax.numpy as jnp
from jax.experimental import pallas as pl
from jax.experimental.pallas import tpu as pltpu


def _mma_kernel(audio_ref, video_ref, wqT_ref, wkvT_ref, bq_ref, bkv_ref, o_ref):
    Bb, Sa, E = audio_ref.shape
    _, Sv, _ = video_ref.shape

    # Flatten (batch, seq) so projection matmuls are tall (Bb*S rows): better MXU fill.
    a2 = audio_ref[...].reshape(Bb * Sa, E).astype(jnp.bfloat16)
    v2 = video_ref[...].reshape(Bb * Sv, E).astype(jnp.bfloat16)

    # Projections. Weights arrive pre-transposed (x @ W.T == x @ W_T) and already bf16;
    # accumulate in f32 on the MXU, then add the f32 bias.
    q2 = jnp.dot(a2, wqT_ref[...], preferred_element_type=jnp.float32) + bq_ref[...]
    kv2 = jnp.dot(v2, wkvT_ref[...], preferred_element_type=jnp.float32) + bkv_ref[...]

    q = q2.reshape(Bb, Sa, E)
    kv = kv2.reshape(Bb, Sv, 2 * E)
    k = kv[:, :, :E]           # fused K|V split (static lane slices)
    v = kv[:, :, E:]

    # Scaled scores: contract the embed dims directly — no transpose of k.
    scale = 1.0 / math.sqrt(E)
    s = jnp.einsum("bqe,bke->bqk",
                   q.astype(jnp.bfloat16), k.astype(jnp.bfloat16),
                   preferred_element_type=jnp.float32) * scale

    # Numerically-stable softmax in f32; reciprocal on the EUP.
    m = jnp.max(s, axis=-1, keepdims=True)
    p = jnp.exp(s - m)
    p = p * pl.reciprocal(jnp.sum(p, axis=-1, keepdims=True), approx=True)

    out = jnp.einsum("bqk,bke->bqe",
                     p.astype(jnp.bfloat16), v.astype(jnp.bfloat16),
                     preferred_element_type=jnp.float32)
    o_ref[...] = out.astype(o_ref.dtype)


def _pick_block_b(batch, seq_q, target_rows=256, min_rows_per_step=128):
    """How many batches to fuse per grid step.

    Targets ~target_rows projected rows per step (amortizes per-step overhead and MXU fill),
    but keeps >=2 parallel grid steps (feeds both v7x TensorCores) when that does not drop a
    step below ~min_rows_per_step rows.
    """
    divisors = [d for d in range(1, batch + 1) if batch % d == 0]
    cap = max(1, target_rows // max(seq_q, 1))
    bb = max([d for d in divisors if d <= cap], default=1)
    if batch // bb < 2:
        cand = [d for d in divisors if batch // d >= 2 and d * seq_q >= min_rows_per_step]
        if cand:
            bb = max(cand)
    return bb


def multimodal_attention(audio_memory, video_memory, params, *, block_b=None):
    """audio_memory: (B, Sa, E), video_memory: (B, Sv, E) -> (B, Sa, E)."""
    B, Sa, E = audio_memory.shape
    Bv, Sv, Ev = video_memory.shape
    assert B == Bv and E == Ev

    if block_b is None:
        block_b = _pick_block_b(B, Sa)
    assert B % block_b == 0
    num_blocks = B // block_b

    # One-time parameter prep: pre-transpose (kills in-kernel XLU transposes), fuse K+V into a
    # single (E, 2E) weight, cast weights to bf16 (halves their VMEM/DMA bytes). Biases stay f32.
    wqT = params["wq"].T.astype(jnp.bfloat16)                                  # (E, E)
    wkvT = jnp.concatenate([params["wk"], params["wv"]], axis=0).T             # (E, 2E)
    wkvT = wkvT.astype(jnp.bfloat16)
    bq2 = params["bq"].reshape(1, E).astype(jnp.float32)                       # (1, E)
    bkv2 = jnp.concatenate([params["bk"], params["bv"]]).reshape(1, 2 * E)     # (1, 2E)
    bkv2 = bkv2.astype(jnp.float32)

    const_idx = lambda b: (0, 0)   # grid-invariant weight/bias blocks

    return pl.pallas_call(
        _mma_kernel,
        out_shape=jax.ShapeDtypeStruct((B, Sa, E), audio_memory.dtype),
        grid_spec=pltpu.PrefetchScalarGridSpec(
            num_scalar_prefetch=0,
            grid=(num_blocks,),
            in_specs=[
                pl.BlockSpec((block_b, Sa, E), lambda b: (b, 0, 0)),   # audio
                pl.BlockSpec((block_b, Sv, E), lambda b: (b, 0, 0)),   # video
                pl.BlockSpec((E, E), const_idx),                       # Wq^T
                pl.BlockSpec((E, 2 * E), const_idx),                   # [Wk;Wv]^T fused
                pl.BlockSpec((1, E), const_idx),                       # bq
                pl.BlockSpec((1, 2 * E), const_idx),                   # [bk|bv] fused
            ],
            out_specs=pl.BlockSpec((block_b, Sa, E), lambda b: (b, 0, 0)),
        ),
        compiler_params=pltpu.CompilerParams(
            dimension_semantics=("parallel",),
            # Conservative cross-generation budget (v7x: 64 MiB physical / 32 MiB scoped default).
            vmem_limit_bytes=32 * 1024 * 1024,
        ),
    )(audio_memory, video_memory, wqT, wkvT, bq2, bkv2)


def _reference(audio, video, params):
    E = audio.shape[-1]
    q = audio @ params["wq"].T + params["bq"]
    k = video @ params["wk"].T + params["bk"]
    v = video @ params["wv"].T + params["bv"]
    s = jnp.einsum("bqe,bke->bqk", q, k) / math.sqrt(E)
    p = jax.nn.softmax(s, axis=-1)
    return jnp.einsum("bqk,bke->bqe", p, v)


if __name__ == "__main__":
    B, Sa, Sv, E = 2, 8, 8, 32
    key = jax.random.PRNGKey(0)
    keys = jax.random.split(key, 8)

    # Deterministic parameter init (nn.Linear-like uniform bound).
    bound = 1.0 / math.sqrt(E)
    params = {
        "wq": jax.random.uniform(keys[0], (E, E), jnp.float32, -bound, bound),
        "bq": jax.random.uniform(keys[1], (E,), jnp.float32, -bound, bound),
        "wk": jax.random.uniform(keys[2], (E, E), jnp.float32, -bound, bound),
        "bk": jax.random.uniform(keys[3], (E,), jnp.float32, -bound, bound),
        "wv": jax.random.uniform(keys[4], (E, E), jnp.float32, -bound, bound),
        "bv": jax.random.uniform(keys[5], (E,), jnp.float32, -bound, bound),
    }

    audio_memory = jax.random.normal(keys[6], (B, Sa, E), jnp.float32)
    video_memory = jax.random.normal(keys[7], (B, Sv, E), jnp.float32)

    out = multimodal_attention(audio_memory, video_memory, params)
    out = jax.block_until_ready(out)

    ref = _reference(audio_memory, video_memory, params)
    assert out.shape == (B, Sa, E)
    # bf16 MXU inputs + approx reciprocal => looser tolerance than a pure-f32 kernel.
    assert jnp.allclose(out, ref, atol=3e-2, rtol=3e-2), "mismatch vs reference"

    print("KERNEL_OK")
</pallas_src>

<mosaic_0001>
module attributes {stable_mosaic.version = 11 : i64} {
  func.func @_mma_kernel(%arg0: i32, %arg1: memref<2x8x32xf32, #tpu.memory_space<vmem>>, %arg2: memref<2x8x32xf32, #tpu.memory_space<vmem>>, %arg3: memref<32x32xbf16, #tpu.memory_space<vmem>>, %arg4: memref<32x64xbf16, #tpu.memory_space<vmem>>, %arg5: memref<1x32xf32, #tpu.memory_space<vmem>>, %arg6: memref<1x64xf32, #tpu.memory_space<vmem>>, %arg7: memref<2x8x32xf32, #tpu.memory_space<vmem>>) attributes {dimension_semantics = [#tpu.dimension_semantics<parallel>], iteration_bounds = array<i64: 1>, scalar_prefetch = 0 : i64, scratch_operands = 0 : i64, tpu.core_type = #tpu.core_type<tc>, window_params = [{transform_indices = @transform_0, window_bounds = array<i64: 2, 8, 32>}, {transform_indices = @transform_1, window_bounds = array<i64: 2, 8, 32>}, {pipeline_mode = #tpu.pipeline_mode<synchronous>, transform_indices = @transform_2, window_bounds = array<i64: 32, 32>}, {pipeline_mode = #tpu.pipeline_mode<synchronous>, transform_indices = @transform_3, window_bounds = array<i64: 32, 64>}, {pipeline_mode = #tpu.pipeline_mode<synchronous>, transform_indices = @transform_4, window_bounds = array<i64: 1, 32>}, {pipeline_mode = #tpu.pipeline_mode<synchronous>, transform_indices = @transform_5, window_bounds = array<i64: 1, 64>}, {transform_indices = @transform_6, window_bounds = array<i64: 2, 8, 32>}]} {
    %c0 = arith.constant 0 : index
    %c0_0 = arith.constant 0 : index
    %c0_1 = arith.constant 0 : index
    %0 = vector.load %arg1[%c0, %c0_0, %c0_1] : memref<2x8x32xf32, #tpu.memory_space<vmem>>, vector<2x8x32xf32>
    %1 = vector.shape_cast %0 : vector<2x8x32xf32> to vector<16x32xf32>
    %2 = arith.truncf %1 : vector<16x32xf32> to vector<16x32xbf16>
    %c0_2 = arith.constant 0 : index
    %c0_3 = arith.constant 0 : index
    %c0_4 = arith.constant 0 : index
    %3 = vector.load %arg2[%c0_2, %c0_3, %c0_4] : memref<2x8x32xf32, #tpu.memory_space<vmem>>, vector<2x8x32xf32>
    %4 = vector.shape_cast %3 : vector<2x8x32xf32> to vector<16x32xf32>
    %5 = arith.truncf %4 : vector<16x32xf32> to vector<16x32xbf16>
    %c0_5 = arith.constant 0 : index
    %c0_6 = arith.constant 0 : index
    %6 = vector.load %arg3[%c0_5, %c0_6] : memref<32x32xbf16, #tpu.memory_space<vmem>>, vector<32x32xbf16>
    %cst = arith.constant dense<0.000000e+00> : vector<16x32xf32>
    %7 = tpu.matmul %2, %6, %cst {dimension_numbers = #tpu.dot_dimension_numbers<[1], [0], [0], [1], [0, 0, 1, 1], [], []>} : vector<16x32xbf16>, vector<32x32xbf16>, vector<16x32xf32> -> vector<16x32xf32>
    %c0_7 = arith.constant 0 : index
    %c0_8 = arith.constant 0 : index
    %8 = vector.load %arg5[%c0_7, %c0_8] : memref<1x32xf32, #tpu.memory_space<vmem>>, vector<1x32xf32>
    %9 = vector.broadcast %8 : vector<1x32xf32> to vector<16x32xf32>
    %10 = arith.addf %7, %9 : vector<16x32xf32>
    %c0_9 = arith.constant 0 : index
    %c0_10 = arith.constant 0 : index
    %11 = vector.load %arg4[%c0_9, %c0_10] : memref<32x64xbf16, #tpu.memory_space<vmem>>, vector<32x64xbf16>
    %cst_11 = arith.constant dense<0.000000e+00> : vector<16x64xf32>
    %12 = tpu.matmul %5, %11, %cst_11 {dimension_numbers = #tpu.dot_dimension_numbers<[1], [0], [0], [1], [0, 0, 1, 1], [], []>} : vector<16x32xbf16>, vector<32x64xbf16>, vector<16x64xf32> -> vector<16x64xf32>
    %c0_12 = arith.constant 0 : index
    %c0_13 = arith.constant 0 : index
    %13 = vector.load %arg6[%c0_12, %c0_13] : memref<1x64xf32, #tpu.memory_space<vmem>>, vector<1x64xf32>
    %14 = vector.broadcast %13 : vector<1x64xf32> to vector<16x64xf32>
    %15 = arith.addf %12, %14 : vector<16x64xf32>
    %16 = vector.shape_cast %10 : vector<16x32xf32> to vector<2x8x32xf32>
    %17 = vector.shape_cast %15 : vector<16x64xf32> to vector<2x8x64xf32>
    %18 = vector.extract_strided_slice %17 {offsets = [0, 0, 0], sizes = [2, 8, 32], strides = [1, 1, 1]} : vector<2x8x64xf32> to vector<2x8x32xf32>
    %19 = vector.extract_strided_slice %17 {offsets = [0, 0, 32], sizes = [2, 8, 32], strides = [1, 1, 1]} : vector<2x8x64xf32> to vector<2x8x32xf32>
    %20 = arith.truncf %16 : vector<2x8x32xf32> to vector<2x8x32xbf16>
    %21 = arith.truncf %18 : vector<2x8x32xf32> to vector<2x8x32xbf16>
    "tpu.trace_start"() <{level = 10 : i32, message = "bqe,bke->bqk"}> : () -> ()
    %cst_14 = arith.constant dense<0.000000e+00> : vector<2x8x8xf32>
    %22 = tpu.matmul %20, %21, %cst_14 {dimension_numbers = #tpu.dot_dimension_numbers<[2], [2], [1], [1], [0, 0, 0, 1, 1, 1], [0], [0]>} : vector<2x8x32xbf16>, vector<2x8x32xbf16>, vector<2x8x8xf32> -> vector<2x8x8xf32>
    "tpu.trace_stop"() : () -> ()
    %cst_15 = arith.constant 0.176776692 : f32
    %23 = vector.broadcast %cst_15 : f32 to vector<2x8x8xf32>
    %24 = arith.mulf %22, %23 : vector<2x8x8xf32>
    %cst_16 = arith.constant dense<0xFF800000> : vector<2x8xf32>
    %25 = vector.multi_reduction <maximumf>, %24, %cst_16 [2] : vector<2x8x8xf32> to vector<2x8xf32>
    %26 = vector.shape_cast %25 : vector<2x8xf32> to vector<2x8x1xf32>
    %27 = vector.broadcast %26 : vector<2x8x1xf32> to vector<2x8x8xf32>
    %28 = arith.subf %24, %27 : vector<2x8x8xf32>
    %29 = math.exp %28 : vector<2x8x8xf32>
    %cst_17 = arith.constant dense<0.000000e+00> : vector<2x8xf32>
    %30 = vector.multi_reduction <add>, %29, %cst_17 [2] : vector<2x8x8xf32> to vector<2x8xf32>
    %31 = vector.shape_cast %30 : vector<2x8xf32> to vector<2x8x1xf32>
    %32 = tpu.reciprocal %31 {approx = true} : vector<2x8x1xf32> -> vector<2x8x1xf32>
    %33 = vector.broadcast %32 : vector<2x8x1xf32> to vector<2x8x8xf32>
    %34 = arith.mulf %29, %33 : vector<2x8x8xf32>
    %35 = arith.truncf %34 : vector<2x8x8xf32> to vector<2x8x8xbf16>
    %36 = arith.truncf %19 : vector<2x8x32xf32> to vector<2x8x32xbf16>
    "tpu.trace_start"() <{level = 10 : i32, message = "bqk,bke->bqe"}> : () -> ()
    %cst_18 = arith.constant dense<0.000000e+00> : vector<2x8x32xf32>
    %37 = tpu.matmul %35, %36, %cst_18 {dimension_numbers = #tpu.dot_dimension_numbers<[2], [1], [1], [2], [0, 0, 0, 1, 1, 2], [0], [0]>} : vector<2x8x8xbf16>, vector<2x8x32xbf16>, vector<2x8x32xf32> -> vector<2x8x32xf32>
    "tpu.trace_stop"() : () -> ()
    %c0_19 = arith.constant 0 : index
    %c0_20 = arith.constant 0 : index
    %c0_21 = arith.constant 0 : index
    %38 = vector.load %arg7[%c0_19, %c0_20, %c0_21] : memref<2x8x32xf32, #tpu.memory_space<vmem>>, vector<2x8x32xf32>
    tpu.vector_store %arg7[%c0_19, %c0_20, %c0_21], %37 {strides = array<i32>} : memref<2x8x32xf32, #tpu.memory_space<vmem>>, vector<2x8x32xf32>,
    return
  }
  func.func @transform_0(%arg0: i32) -> (i32, i32, i32) {
    %c0_i32 = arith.constant 0 : i32
    %c0_i32_0 = arith.constant 0 : i32
    %c0_i32_1 = arith.constant 0 : i32
    return %arg0, %c0_i32, %c0_i32_0 : i32, i32, i32
  }
  func.func @transform_1(%arg0: i32) -> (i32, i32, i32) {
    %c0_i32 = arith.constant 0 : i32
    %c0_i32_0 = arith.constant 0 : i32
    %c0_i32_1 = arith.constant 0 : i32
    return %arg0, %c0_i32, %c0_i32_0 : i32, i32, i32
  }
  func.func @transform_2(%arg0: i32) -> (i32, i32) {
    %c0_i32 = arith.constant 0 : i32
    %c0_i32_0 = arith.constant 0 : i32
    %c0_i32_1 = arith.constant 0 : i32
    return %c0_i32, %c0_i32_0 : i32, i32
  }
  func.func @transform_3(%arg0: i32) -> (i32, i32) {
    %c0_i32 = arith.constant 0 : i32
    %c0_i32_0 = arith.constant 0 : i32
    %c0_i32_1 = arith.constant 0 : i32
    return %c0_i32, %c0_i32_0 : i32, i32
  }
  func.func @transform_4(%arg0: i32) -> (i32, i32) {
    %c0_i32 = arith.constant 0 : i32
    %c0_i32_0 = arith.constant 0 : i32
    %c0_i32_1 = arith.constant 0 : i32
    return %c0_i32, %c0_i32_0 : i32, i32
  }
  func.func @transform_5(%arg0: i32) -> (i32, i32) {
    %c0_i32 = arith.constant 0 : i32
    %c0_i32_0 = arith.constant 0 : i32
    %c0_i32_1 = arith.constant 0 : i32
    return %c0_i32, %c0_i32_0 : i32, i32
  }
  func.func @transform_6(%arg0: i32) -> (i32, i32, i32) {
    %c0_i32 = arith.constant 0 : i32
    %c0_i32_0 = arith.constant 0 : i32
    %c0_i32_1 = arith.constant 0 : i32
    return %arg0, %c0_i32, %c0_i32_0 : i32, i32, i32
  }
}

</mosaic_0001>

<bundles_post_ra>
// kernel: tpu_custom_call.1
= control target key start
LH: loop header
LB: loop body
LE: loop exit
PB: predicated region body
PF: predicated region fallthrough
CT: control target
= control target key end

     0   :  { %11 = vsyncpa [#allocation3], 0  ;;  %s573_s0 = inlined_call_operand.hbm [shape: f32[2,8,32], index: 0, kind: input, shape index: {}]   ;;  %s574_s1 = inlined_call_operand.hbm [shape: f32[2,8,32], index: 1, kind: input, shape index: {}]   ;;  %s575_s2 = inlined_call_operand.hbm [shape: bf16[32,32], index: 2, kind: input, shape index: {}]   ;;  %s576_s3 = inlined_call_operand.hbm [shape: bf16[32,64], index: 3, kind: input, shape index: {}]   ;;  %s577_s4 = inlined_call_operand.vmem [shape: f32[1,32], index: 4, kind: input, shape index: {}]   ;;  %s578_s5 = inlined_call_operand.vmem [shape: f32[1,64], index: 5, kind: input, shape index: {}]   ;;  %s579_s6 = inlined_call_operand.hbm [shape: f32[2,8,32], index: 6, kind: output, shape index: {}]  }
   0x1   :  { %12 = vsyncpa [#allocation6], 0 }
   0x2   :  { %13 = vsyncpa [#allocation9], 0 }
   0x3   :  { %14 = vsyncpa [#allocation4], 0  ;;  %s32_s23 = sshll.u32 %s574_s1, 4  ;;  %s484_s24 = smov [#allocation5]   ;;  %s33_s23 = int_to_ptr.hbm [resolvable:$true] %s32_s23 }
   0x4   :  { %s34_s25 = sshll.u32 %s484_s24, 4  ;;  %s19_s28 = sshll.u32 %s573_s0, 4  ;;  %s35_s25 = int_to_ptr.vmem [resolvable:$true] %s34_s25  ;;  %s20_s28 = int_to_ptr.hbm [resolvable:$true] %s19_s28 }
   0x5   :  { %s485_s29 = smov 128   ;;  %s486_s30 = smov 8  }
   0x6   :  { %40 = dma.hbm_to_vmem [thread:$0]  %s33_s23, 256, %s35_s25, [#allocation6], %s485_s29, %s485_s29, %s486_s30  }
   0x7   :  { %s487_s7 = smov [#allocation2]   ;;  %s45_s1 = sshll.u32 %s575_s2, 4  ;;  %s46_s1 = int_to_ptr.hbm [resolvable:$true] %s45_s1 }
   0x8   :  { %s21_s8 = sshll.u32 %s487_s7, 4  ;;  %s488_s0 = smov [#allocation7]   ;;  %s22_s8 = int_to_ptr.vmem [resolvable:$true] %s21_s8 }
   0x9   :  { %27 = dma.hbm_to_vmem [thread:$0]  %s20_s28, 256, %s22_s8, [#allocation3], %s485_s29, %s485_s29, %s486_s30  }
   0xa   :  { %s47_s11 = sshll.u32 %s488_s0, 4  ;;  %s58_s14 = sshll.u32 %s576_s3, 4  ;;  %s48_s11 = int_to_ptr.vmem [resolvable:$true] %s47_s11  ;;  %s59_s14 = int_to_ptr.hbm [resolvable:$true] %s58_s14 }
   0xb   :  { %s489_s15 = smov 64   ;;  %s490_s16 = smov 4  }
   0xc   :  { %53 = dma.hbm_to_vmem [thread:$0]  %s46_s1, 256, %s48_s11, [#allocation6], %s489_s15, %s489_s15, %s490_s16  }
   0xd   :  { %s491_s17 = smov [#allocation8]  }
   0xe   :  { %s60_s18 = sshll.u32 %s491_s17, 4  ;;  %s61_s18 = int_to_ptr.vmem [resolvable:$true] %s60_s18 }
   0xf   :  { %66 = dma.hbm_to_vmem [thread:$0]  %s59_s14, 256, %s61_s18, [#allocation9], %s489_s15, %s489_s15, %s490_s16  }
  0x10   :  { %476 = dma.done.wait [#allocation3], 256  }
  0x11   :  { %477 = vsyncadd [#allocation3], 4294967040 }
  0x12   :  { %478 = dma.done.wait [#allocation6], 512  }
  0x13   :  { %479 = vsyncadd [#allocation6], 4294966784 }
  0x14   :  { %480 = dma.done.wait [#allocation9], 256  }
  0x15   :  { %481 = vsyncadd [#allocation9], 4294967040  ;;  %v333_v0 = vld [vmem:[#allocation7 + $0x8] sm:$0xff]  ;;  %v335_v1 = vld [vmem:[#allocation8 + $0x8] sm:$0xff]  ;;  %vm114_vm0 = vcmask 261120   ;;  %s492_s21 = smov 96  }
  0x16   :  { %v332_v2 = vld [vmem:[#allocation7] sm:$0xff]  ;;  %v334_v3 = vld [vmem:[#allocation8] sm:$0xff]  ;;  %v89_v5 = vld [vmem:[#allocation2 + $0x8] sm:$0xff]  ;;  %124 = vmatpush.bf16.msra.mxu0 %v333_v0  ;;  %161 = vmatpush.bf16.msra.mxu1 %v335_v1  ;;  %vm246_vm1 = vcmask 1043456   ;;  %vm213_vm2 = vcmask 64512   ;;  %s295_s24 = sshll.u32 %s579_s6, 4  ;;  %s296_s24 = int_to_ptr.hbm [resolvable:$true] %s295_s24 }
  0x17   :  { %v88_v4 = vld [vmem:[#allocation2] sm:$0xff]  ;;  %v91_v6 = vld [vmem:[#allocation5] sm:$0xff]  ;;  %v92_v7 = vld [vmem:[#allocation5 + $0x8] sm:$0xff] }
  0x18   :  { %v90_v8 = vpack.c.bf16 %v89_v5, %v88_v4  ;;  %v93_v9 = vpack.c.bf16 %v92_v7, %v91_v6  ;;  %v347_v10 = vld [vmem:[%s578_s5] ss:$0 sm:$0xff] }
  0x19   :  { %v346_v12 = vld [vmem:[%s577_s4] ss:$0 sm:$0xff]  ;;  %s493_s4 = smov [#allocation10]  }
  0x1a   :  { %125 = vmatpush.bf16.msra.mxu0 %v332_v2  ;;  %162 = vmatpush.bf16.msra.mxu1 %v334_v3  ;;  %s293_s5 = sshll.u32 %s493_s4, 4  ;;  %s294_s5 = int_to_ptr.vmem [resolvable:$true] %s293_s5 }
  0x1d   :  { %318 = vmatmul.msk.bf16.vlgmr.msra.gmra.mxu0 %vm114_vm0, %v90_v8  ;;  %327 = vmatmul.msk.bf16.vlgmr.msra.gmra.mxu1 %vm114_vm0, %v93_v9 }
  0x9a   :  { %v164_v11 = vpop.f32.mrf.mxu1  ;;  %v127_v14 = vpop.f32.mrf.mxu0 }
  0x9b   :  { %v165_v13 = vadd.f32 %v347_v10, %v164_v11  ;;  %v128_v16 = vadd.f32 %v346_v12, %v127_v14 }
  0x9d   :  { %v171_v15 = vpack.c.bf16 %v165_v13, %v165_v13  ;;  %v169_v21 = vpack.c.bf16 %v128_v16, %v128_v16 }
  0x9f   :  { %v177_v17 = vsel %vm114_vm0, %v171_v15, 0  ;;  %v239_v18 = vunpack.c.l.b16 %v171_v15 }
  0xa0   :  { %186 = vmatpush.bf16.xpose.msra.mxu2 %v177_v17 }
  0xa1   :  { %v240_v19 = vpack.c.b16 %v239_v18, %v239_v18 }
  0xa2   :  { %v166_v20 = vpop.f32.mrf.mxu1  ;;  %v129_v24 = vpop.f32.mrf.mxu0 }
  0xa3   :  { %v167_v22 = vadd.f32 %v347_v10, %v166_v20  ;;  %241 = vrot.lane.b32.xlu2 %v240_v19, %s492_s21  ;;  %v130_v27 = vadd.f32 %v346_v12, %v129_v24 }
  0xa5   :  { %v172_v23 = vpack.c.bf16 %v167_v22, %v167_v22  ;;  %v170_v29 = vpack.c.bf16 %v130_v27, %v130_v27 }
  0xa7   :  { %v264_v25 = vunpack.c.l.b16 %v172_v23  ;;  %328 = vmatmul.msk.bf16.vlgmr.msra.gmra.mxu2 %vm114_vm0, %v169_v21  ;;  %v196_v26 = vsel %vm114_vm0, %v172_v23, 0 }
  0xa8   :  { %205 = vmatpush.bf16.xpose.msra.mxu3 %v196_v26 }
  0xa9   :  { %v265_v28 = vpack.c.b16 %v264_v25, %v264_v25 }
  0xab   :  { %266 = vrot.lane.b32.xlu2 %v265_v28, %s492_s21 }
  0xaf   :  { %329 = vmatmul.msk.bf16.vlgmr.msra.gmra.mxu3 %vm114_vm0, %v170_v29 }
  0xfd   :  { %v242_v30 = vpop.permute.xlu2 %241 }
  0xfe   :  { %v248_v31 = vsel %vm246_vm1, %v242_v30, 0 }
  0xff   :  { %257 = vmatpush.bf16.msrb.mxu0 %v248_v31 }
 0x105   :  { %v267_v32 = vpop.permute.xlu2 %266 }
 0x106   :  { %v272_v33 = vsel %vm246_vm1, %v267_v32, 0 }
 0x107   :  { %281 = vmatpush.bf16.msrb.mxu1 %v272_v33 }
 0x12a   :  { %v188_v34 = vpop.f32.mrf.mxu2 }
 0x12b   :  { %v211_v35 = vmul.f32 0.17677669, %v188_v34 }
 0x12d   :  { %v214_v36 = vsel %vm213_vm2, %v211_v35, -inf }
 0x12e   :  { %215 = vmax.xlane.f32.xlu0 %v214_v36 }
 0x132   :  { %v190_v37 = vpop.f32.mrf.mxu2  ;;  %v207_v38 = vpop.f32.mrf.mxu3 }
 0x133   :  { %v212_v39 = vmul.f32 0.17677669, %v207_v38 }
 0x135   :  { %v217_v40 = vsel %vm213_vm2, %v212_v39, -inf }
 0x136   :  { %218 = vmax.xlane.f32.xlu0 %v217_v40 }
 0x13a   :  { %v209_v41 = vpop.f32.mrf.mxu3 }
 0x1a1   :  { %v216_v42 = vpop.xlane.xlu0 %215 }
 0x1a2   :  { %v220_v43 = vsub.f32 %v211_v35, %v216_v42 }
 0x1a4   :  { %v222_v44 = vmul.f32 1.442695, %v220_v43 }
 0x1a6   :  { %348 = vpow2.f32 %v222_v44 }
 0x1a9   :  { %v219_v45 = vpop.xlane.xlu0 %218 }
 0x1aa   :  { %v221_v46 = vsub.f32 %v212_v39, %v219_v45 }
 0x1ac   :  { %v349_v47 = vpop.eup %348  ;;  %v224_v48 = vmul.f32 1.442695, %v221_v46 }
 0x1ad   :  { %v226_v49 = vsel %vm213_vm2, %v349_v47, 0.0 }
 0x1ae   :  { %350 = vpow2.f32 %v224_v48  ;;  %227 = vadd.xlane.f32.xlu1 %v226_v49 }
 0x1b4   :  { %v351_v50 = vpop.eup %350 }
 0x1b5   :  { %v229_v51 = vsel %vm213_vm2, %v351_v50, 0.0 }
 0x1b6   :  { %230 = vadd.xlane.f32.xlu1 %v229_v51 }
 0x221   :  { %v228_v52 = vpop.xlane.xlu1 %227 }
 0x222   :  { %352 = vrcp.f32 %v228_v52 }
 0x228   :  { %v353_v53 = vpop.eup %352 }
 0x229   :  { %v234_v54 = vmul.f32 %v353_v53, %v349_v47  ;;  %v231_v55 = vpop.xlane.xlu1 %230 }
 0x22a   :  { %354 = vrcp.f32 %v231_v55 }
 0x22b   :  { %v236_v56 = vpack.c.bf16 %v234_v54, %v234_v54 }
 0x22d   :  { %330 = vmatmul.msk.bf16.vlgmr.msrb.gmra.mxu0 %vm213_vm2, %v236_v56 }
 0x230   :  { %v355_v57 = vpop.eup %354 }
 0x231   :  { %v235_v58 = vmul.f32 %v355_v57, %v351_v50 }
 0x233   :  { %v237_v59 = vpack.c.bf16 %v235_v58, %v235_v58 }
 0x235   :  { %331 = vmatmul.msk.bf16.vlgmr.msrb.gmra.mxu1 %vm213_vm2, %v237_v59 }
 0x2aa   :  { %v259_v60 = vpop.f32.mrf.mxu0 }
 0x2ab   :  { %287 = vst.msk [vmem:[#allocation10] sm:$0xff] %vm114_vm0, %v259_v60 }
 0x2b2   :  { %v261_v61 = vpop.f32.mrf.mxu0  ;;  %v283_v62 = vpop.f32.mrf.mxu1 }
 0x2b3   :  { %288 = vst.msk [vmem:[#allocation10 + $0x8] sm:$0xff] %vm114_vm0, %v283_v62 }
 0x2b4   :  { %301 = dma.vmem_to_hbm [thread:$0]  %s294_s5, 256, %s296_s24, [#allocation4], %s485_s29, %s485_s29, %s486_s30  }
 0x2ba   :  { %v285_v63 = vpop.f32.mrf.mxu1 }
 0x2bb   :  { %482 = dma.done.wait [#allocation4], 256  }
 0x2bc   :  { %483 = vsyncadd [#allocation4], 4294967040 }
 0x2bd   :  { %306 = vsyncpa [#allocation3], 1 }
 0x2be   :  { %307 = vsyncpa [#allocation6], 1 }
 0x2bf   :  { %308 = vsyncpa [#allocation9], 1 }
 0x2c0   :  { %309 = vsyncpa [#allocation4], 1 }

</bundles_post_ra>
